<compile_context>
chip_gen: v6e
topology: v6e:2x2x1
jax: 0.10.0
libtpu: 0.0.40
codegen_flags: <defaults>
</compile_context>

<pallas_src>
import math

import jax
import jax.numpy as jnp
from jax.experimental import pallas as pl
from jax.experimental.pallas import tpu as pltpu


def _embed_kernel(x_ref, nb_ref, wx_ref, wnb_ref, b_ref, pe_ref, out_ref):
    # x_ref:   (1, ts, F)   raw input rows  [data, cov_0..cov_{c-1}, ..., seq_id]
    # nb_ref:  (1, ts, 2)   circular-conv neighbour taps [d_{t-1}, d_{t+1}]
    # wx_ref:  (F, Dp)      fused per-channel weights (conv centre tap + cov linear
    #                       + seq_id/num_class row), zero-padded to Dp lanes
    # wnb_ref: (2, Dp)      conv side taps
    # b_ref:   (1, Dp)      b_cov + b_conv - 0.5 * w_cov[seq]
    # pe_ref:  (ts, Dp)     precomputed sinusoidal position table slice
    # out_ref: (1, ts, Dp)
    acc = jnp.dot(x_ref[0], wx_ref[...],
                  preferred_element_type=jnp.float32,
                  precision=jax.lax.Precision.HIGHEST)
    acc = acc + jnp.dot(nb_ref[0], wnb_ref[...],
                        preferred_element_type=jnp.float32,
                        precision=jax.lax.Precision.HIGHEST)
    out_ref[0] = acc + b_ref[...] + pe_ref[...]


def _pick_seq_tile(S, max_tile=512):
    """Largest multiple-of-8 divisor of S <= max_tile (or S itself)."""
    if S <= max_tile:
        return S
    start = max_tile - (max_tile % 8)
    for ts in range(start, 7, -8):
        if S % ts == 0:
            return ts
    return S  # fallback: whole sequence as one block (full-dim block is legal)


def single_step_embedding(x, w_cov, b_cov, w_conv, b_conv, pos_vec,
                          *, cov_size, num_class, seq_tile=None):
    """x: (B, S, F) float32.  Returns (B, S, D) float32."""
    x = x.astype(jnp.float32)
    B, S, F = x.shape
    D = w_cov.shape[1]

    ts = _pick_seq_tile(S) if seq_tile is None else seq_tile
    assert S % ts == 0 and (ts == S or ts % 8 == 0), "seq tile must divide S and be *8"

    # Lane-dense output: pad d_model to a multiple of 128, slice after the call.
    Dp = D if D % 128 == 0 else pl.cdiv(D, 128) * 128
    pad = Dp - D

    # ---- one-time parameter folding (outside the hot path) -----------------
    w_cov = w_cov.astype(jnp.float32)
    w_conv = w_conv.astype(jnp.float32)
    wx = jnp.zeros((F, D), jnp.float32)
    wx = wx.at[0].set(w_conv[1])                                  # conv centre tap
    wx = wx.at[1:1 + cov_size].set(w_cov[:cov_size])              # covariate linear
    wx = wx.at[F - 1].add(w_cov[cov_size] / float(num_class))     # seq_id / num_class
    wnb = jnp.stack([w_conv[0], w_conv[2]], axis=0)               # (2, D) side taps
    bias = (b_cov.reshape(1, D).astype(jnp.float32)
            + b_conv.reshape(1, D).astype(jnp.float32)
            - 0.5 * w_cov[cov_size:cov_size + 1])                 # fold the "-0.5"

    # ---- precomputed sinusoidal position table (hoisted out of the kernel) --
    pos = jnp.arange(S, dtype=jnp.float32)[:, None]
    scaled = pos / pos_vec.reshape(1, D).astype(jnp.float32)
    col = jnp.arange(D)
    pe = jnp.where(col % 2 == 0, jnp.sin(scaled), jnp.cos(scaled))  # (S, D)

    if pad:
        wx = jnp.pad(wx, ((0, 0), (0, pad)))
        wnb = jnp.pad(wnb, ((0, 0), (0, pad)))
        bias = jnp.pad(bias, ((0, 0), (0, pad)))
        pe = jnp.pad(pe, ((0, 0), (0, pad)))

    # Circular-conv neighbour taps (only 2 extra channels; x passed untouched).
    d = x[:, :, 0]
    nb = jnp.stack([jnp.roll(d, 1, axis=1), jnp.roll(d, -1, axis=1)], axis=-1)

    grid = (B, S // ts)
    out = pl.pallas_call(
        _embed_kernel,
        out_shape=jax.ShapeDtypeStruct((B, S, Dp), jnp.float32),
        grid=grid,
        in_specs=[
            pl.BlockSpec((1, ts, F), lambda b, s: (b, s, 0)),
            pl.BlockSpec((1, ts, 2), lambda b, s: (b, s, 0)),
            pl.BlockSpec((F, Dp), lambda b, s: (0, 0)),
            pl.BlockSpec((2, Dp), lambda b, s: (0, 0)),
            pl.BlockSpec((1, Dp), lambda b, s: (0, 0)),
            pl.BlockSpec((ts, Dp), lambda b, s: (s, 0)),
        ],
        out_specs=pl.BlockSpec((1, ts, Dp), lambda b, s: (b, s, 0)),
        compiler_params=pltpu.CompilerParams(
            dimension_semantics=("parallel", "parallel")),
    )(x, nb, wx, wnb, bias, pe)

    if pad:
        out = out[:, :, :D]
    return out


def reference(x, w_cov, b_cov, w_conv, b_conv, pos_vec, *, cov_size, num_class):
    covs = x[:, :, 1:1 + cov_size]
    seq_ids = (x[:, :, -1] / num_class - 0.5)[..., None]
    cov_in = jnp.concatenate([covs, seq_ids], axis=-1)
    cov_emb = jnp.einsum("bsc,cd->bsd", cov_in, w_cov,
                         precision=jax.lax.Precision.HIGHEST) + b_cov
    d = x[:, :, 0]
    dwin = jnp.stack([jnp.roll(d, 1, axis=1), d, jnp.roll(d, -1, axis=1)], axis=-1)
    data_emb = jnp.einsum("bsk,kd->bsd", dwin, w_conv,
                          precision=jax.lax.Precision.HIGHEST) + b_conv
    S = x.shape[1]
    D = w_cov.shape[1]
    pos = jnp.arange(S, dtype=jnp.float32)[:, None]
    scaled = pos / pos_vec[None, :]
    idx = jnp.arange(D)
    pe = jnp.where(idx % 2 == 0, jnp.sin(scaled), jnp.cos(scaled))
    return cov_emb + data_emb + pe[None]


if __name__ == "__main__":
    # module hyper-parameters
    cov_size = 3
    num_seq = 4          # num_class
    d_model = 32
    input_size = 16      # == seq_len (position table length)
    batch = 2
    F = cov_size + 2     # [data, cov_0..cov_{c-1}, seq_id]

    key = jax.random.PRNGKey(0)
    kx, kseq, kwc, kwk, kbk = jax.random.split(key, 5)

    # input: (B, S, F); last feature is a sequence-id in [0, num_seq)
    x = jax.random.normal(kx, (batch, input_size, F), dtype=jnp.float32)
    seq_id = jax.random.randint(kseq, (batch, input_size), 0, num_seq)
    x = x.at[:, :, -1].set(seq_id.astype(jnp.float32))

    # parameters (deterministic, matching PyTorch init distributions)
    # Linear(cov_size+1, d_model): xavier_normal weight (stored transposed), zero bias
    fan_in_l, fan_out_l = cov_size + 1, d_model
    xavier_std = math.sqrt(2.0 / (fan_in_l + fan_out_l))
    w_cov = xavier_std * jax.random.normal(kwc, (cov_size + 1, d_model), jnp.float32)
    b_cov = jnp.zeros((1, d_model), jnp.float32)

    # Conv1d(1, d_model, 3): kaiming_normal (fan_in, leaky_relu), weight (D,1,3)
    gain = math.sqrt(2.0 / (1.0 + 0.01 ** 2))
    kaiming_std = gain / math.sqrt(1 * 3)
    w_conv_torch = kaiming_std * jax.random.normal(kwk, (d_model, 1, 3), jnp.float32)
    w_conv = jnp.transpose(w_conv_torch[:, 0, :], (1, 0))          # (3, D)
    bound = 1.0 / math.sqrt(3.0)
    b_conv = jax.random.uniform(kbk, (1, d_model), jnp.float32, -bound, bound)

    pos_vec = jnp.asarray(
        [math.pow(10000.0, 2.0 * (i // 2) / d_model) for i in range(d_model)],
        dtype=jnp.float32)

    ref = reference(x, w_cov, b_cov, w_conv, b_conv, pos_vec,
                    cov_size=cov_size, num_class=num_seq)

    # default tiling: grid = (B, 1) -> 2 parallel steps
    out = single_step_embedding(x, w_cov, b_cov, w_conv, b_conv, pos_vec,
                                cov_size=cov_size, num_class=num_seq)
    out = jax.block_until_ready(out)
    assert out.shape == (batch, input_size, d_model)
    assert jnp.allclose(out, ref, rtol=1e-3, atol=1e-3), "mismatch vs reference"

    # explicit multi-tile path over the sequence axis: grid = (B, 2)
    out2 = single_step_embedding(x, w_cov, b_cov, w_conv, b_conv, pos_vec,
                                 cov_size=cov_size, num_class=num_seq, seq_tile=8)
    out2 = jax.block_until_ready(out2)
    assert jnp.allclose(out2, ref, rtol=1e-3, atol=1e-3), "mismatch vs reference (tiled)"

    print("KERNEL_OK")
</pallas_src>

<mosaic_0001>
module attributes {stable_mosaic.version = 11 : i64} {
  func.func @_embed_kernel(%arg0: i32, %arg1: i32, %arg2: memref<1x16x5xf32, #tpu.memory_space<vmem>>, %arg3: memref<1x16x2xf32, #tpu.memory_space<vmem>>, %arg4: memref<5x128xf32, #tpu.memory_space<vmem>>, %arg5: memref<2x128xf32, #tpu.memory_space<vmem>>, %arg6: memref<1x128xf32, #tpu.memory_space<vmem>>, %arg7: memref<16x128xf32, #tpu.memory_space<vmem>>, %arg8: memref<1x16x128xf32, #tpu.memory_space<vmem>>) attributes {dimension_semantics = [#tpu.dimension_semantics<parallel>, #tpu.dimension_semantics<parallel>], iteration_bounds = array<i64: 2, 1>, scalar_prefetch = 0 : i64, scratch_operands = 0 : i64, tpu.core_type = #tpu.core_type<tc>, window_params = [{transform_indices = @transform_0, window_bounds = array<i64: 1, 16, 5>}, {transform_indices = @transform_1, window_bounds = array<i64: 1, 16, 2>}, {pipeline_mode = #tpu.pipeline_mode<synchronous>, transform_indices = @transform_2, window_bounds = array<i64: 5, 128>}, {pipeline_mode = #tpu.pipeline_mode<synchronous>, transform_indices = @transform_3, window_bounds = array<i64: 2, 128>}, {pipeline_mode = #tpu.pipeline_mode<synchronous>, transform_indices = @transform_4, window_bounds = array<i64: 1, 128>}, {transform_indices = @transform_5, window_bounds = array<i64: 16, 128>}, {transform_indices = @transform_6, window_bounds = array<i64: 1, 16, 128>}]} {
    %c0 = arith.constant 0 : index
    %c0_0 = arith.constant 0 : index
    %c0_1 = arith.constant 0 : index
    %0 = vector.load %arg2[%c0, %c0_0, %c0_1] : memref<1x16x5xf32, #tpu.memory_space<vmem>>, vector<1x16x5xf32>
    %1 = vector.shape_cast %0 : vector<1x16x5xf32> to vector<16x5xf32>
    %c0_2 = arith.constant 0 : index
    %c0_3 = arith.constant 0 : index
    %2 = vector.load %arg4[%c0_2, %c0_3] : memref<5x128xf32, #tpu.memory_space<vmem>>, vector<5x128xf32>
    %cst = arith.constant dense<0.000000e+00> : vector<16x128xf32>
    %3 = tpu.matmul %1, %2, %cst {dimension_numbers = #tpu.dot_dimension_numbers<[1], [0], [0], [1], [0, 0, 1, 1], [], []>, precision = #tpu.contract_precision<fp32>} : vector<16x5xf32>, vector<5x128xf32>, vector<16x128xf32> -> vector<16x128xf32>
    %c0_4 = arith.constant 0 : index
    %c0_5 = arith.constant 0 : index
    %c0_6 = arith.constant 0 : index
    %4 = vector.load %arg3[%c0_4, %c0_5, %c0_6] : memref<1x16x2xf32, #tpu.memory_space<vmem>>, vector<1x16x2xf32>
    %5 = vector.shape_cast %4 : vector<1x16x2xf32> to vector<16x2xf32>
    %c0_7 = arith.constant 0 : index
    %c0_8 = arith.constant 0 : index
    %6 = vector.load %arg5[%c0_7, %c0_8] : memref<2x128xf32, #tpu.memory_space<vmem>>, vector<2x128xf32>
    %cst_9 = arith.constant dense<0.000000e+00> : vector<16x128xf32>
    %7 = tpu.matmul %5, %6, %cst_9 {dimension_numbers = #tpu.dot_dimension_numbers<[1], [0], [0], [1], [0, 0, 1, 1], [], []>, precision = #tpu.contract_precision<fp32>} : vector<16x2xf32>, vector<2x128xf32>, vector<16x128xf32> -> vector<16x128xf32>
    %8 = arith.addf %3, %7 : vector<16x128xf32>
    %c0_10 = arith.constant 0 : index
    %c0_11 = arith.constant 0 : index
    %9 = vector.load %arg6[%c0_10, %c0_11] : memref<1x128xf32, #tpu.memory_space<vmem>>, vector<1x128xf32>
    %10 = vector.broadcast %9 : vector<1x128xf32> to vector<16x128xf32>
    %11 = arith.addf %8, %10 : vector<16x128xf32>
    %c0_12 = arith.constant 0 : index
    %c0_13 = arith.constant 0 : index
    %12 = vector.load %arg7[%c0_12, %c0_13] : memref<16x128xf32, #tpu.memory_space<vmem>>, vector<16x128xf32>
    %13 = arith.addf %11, %12 : vector<16x128xf32>
    %c0_14 = arith.constant 0 : index
    %c0_15 = arith.constant 0 : index
    %c0_16 = arith.constant 0 : index
    %14 = vector.load %arg8[%c0_14, %c0_15, %c0_16] : memref<1x16x128xf32, #tpu.memory_space<vmem>>, vector<1x16x128xf32>
    %15 = vector.shape_cast %14 : vector<1x16x128xf32> to vector<16x128xf32>
    %16 = vector.shape_cast %13 : vector<16x128xf32> to vector<1x16x128xf32>
    tpu.vector_store %arg8[%c0_14, %c0_15, %c0_16], %16 {strides = array<i32>} : memref<1x16x128xf32, #tpu.memory_space<vmem>>, vector<1x16x128xf32>,
    return
  }
  func.func @transform_0(%arg0: i32, %arg1: i32) -> (i32, i32, i32) {
    %c0_i32 = arith.constant 0 : i32
    %c0_i32_0 = arith.constant 0 : i32
    return %arg0, %arg1, %c0_i32 : i32, i32, i32
  }
  func.func @transform_1(%arg0: i32, %arg1: i32) -> (i32, i32, i32) {
    %c0_i32 = arith.constant 0 : i32
    %c0_i32_0 = arith.constant 0 : i32
    return %arg0, %arg1, %c0_i32 : i32, i32, i32
  }
  func.func @transform_2(%arg0: i32, %arg1: i32) -> (i32, i32) {
    %c0_i32 = arith.constant 0 : i32
    %c0_i32_0 = arith.constant 0 : i32
    %c0_i32_1 = arith.constant 0 : i32
    return %c0_i32, %c0_i32_0 : i32, i32
  }
  func.func @transform_3(%arg0: i32, %arg1: i32) -> (i32, i32) {
    %c0_i32 = arith.constant 0 : i32
    %c0_i32_0 = arith.constant 0 : i32
    %c0_i32_1 = arith.constant 0 : i32
    return %c0_i32, %c0_i32_0 : i32, i32
  }
  func.func @transform_4(%arg0: i32, %arg1: i32) -> (i32, i32) {
    %c0_i32 = arith.constant 0 : i32
    %c0_i32_0 = arith.constant 0 : i32
    %c0_i32_1 = arith.constant 0 : i32
    return %c0_i32, %c0_i32_0 : i32, i32
  }
  func.func @transform_5(%arg0: i32, %arg1: i32) -> (i32, i32) {
    %c0_i32 = arith.constant 0 : i32
    %c0_i32_0 = arith.constant 0 : i32
    return %arg1, %c0_i32 : i32, i32
  }
  func.func @transform_6(%arg0: i32, %arg1: i32) -> (i32, i32, i32) {
    %c0_i32 = arith.constant 0 : i32
    %c0_i32_0 = arith.constant 0 : i32
    return %arg0, %arg1, %c0_i32 : i32, i32, i32
  }
}

</mosaic_0001>

<bundles_post_ra>
// kernel: tpu_custom_call.1
= control target key start
LH: loop header
LB: loop body
LE: loop exit
PB: predicated region body
PF: predicated region fallthrough
CT: control target
= control target key end

     0   :  { %11 = vsyncpa [#allocation3], 0  ;;  %s1936_s0 = inlined_call_operand.vmem [shape: f32[2,16,5], index: 0, kind: input, shape index: {}]   ;;  %s1937_s1 = inlined_call_operand.vmem [shape: f32[2,16,2], index: 1, kind: input, shape index: {}]   ;;  %s1938_s2 = inlined_call_operand.vmem [shape: f32[5,128], index: 2, kind: input, shape index: {}]   ;;  %s1939_s3 = inlined_call_operand.vmem [shape: f32[2,128], index: 3, kind: input, shape index: {}]   ;;  %s1940_s4 = inlined_call_operand.vmem [shape: f32[1,128], index: 4, kind: input, shape index: {}]   ;;  %s1941_s5 = inlined_call_operand.vmem [shape: f32[16,128], index: 5, kind: input, shape index: {}]   ;;  %s1942_s6 = inlined_call_operand.hbm [shape: f32[2,16,128], index: 6, kind: output, shape index: {}]  }
   0x1   :  { %13 = vsyncpa [#allocation3 + $0x1], 0  ;;  %s1777_s21 = smov 0   ;;  %s1779_s22 = smov 0  }
   0x2   :  { %s1781_s23 = smov 0   ;;  %s1783_s24 = smov 0  }
   0x3   :  { %s1785_s25 = smov 0   ;;  %s1787_s26 = smov 0  }
   0x4 LB: > { %s1488_s27 = sadd.s32 4294967295, %s1737_s26   ;;  %s1489_s28 = sadd.s32 4294967294, %s1737_s26   ;;  %s1737_s26 = sphi %s1787_s26, %s19_s26   ;;  %s1733_s25 = sphi %s1785_s25, %s1949_s25   ;;  %s1729_s24 = sphi %s1783_s24, %s1948_s24   ;;  %s1725_s23 = sphi %s1781_s23, %s1947_s23   ;;  %s1721_s22 = sphi %s1779_s22, %s1946_s22   ;;  %s1717_s21 = sphi %s1777_s21, %s1945_s21  }
   0x5   : > { %s31_s29 = sadd.s32 1, %s1733_s25  ;;  %s185_s30 = sadd.s32 1, %s1725_s23 }
   0x6   : > { %p33_p0 = scmp.ge.s32.totalorder %s31_s29, 2  ;;  %p195_p1 = scmp.ne.s32.totalorder %s1725_s23, %s1721_s22 }
   0x7   : > { %p196_p2 = scmp.eq.s32.totalorder %s1488_s27, 1  ;;  %p201_p3 = scmp.ne.s32.totalorder %s1721_s22, %s1717_s21 }
   0x8   : > { %s1951_s29 = smov (%p33_p0, %s31_s29), 0  ;;  %p202_p5 = scmp.eq.s32.totalorder %s1489_s28, 1 }
   0x9   : > { %p1817_p4 = por %p196_p2, %p195_p1  ;;  %s180_s8 = ssub.s32 %s1733_s25, %s1951_s29 }
   0xa   : > { %p1493_p6 = scmp.ge.s32.totalorder %s1737_s26, 1  ;;  %p183_p7 = scmp.eq.s32.totalorder %s180_s8, 0 }
   0xb   : > { %p1824_p8 = por %p202_p5, %p201_p3  ;;  %p264_p9 = scmp.lt.s32.totalorder %s1737_s26, 3 }
   0xc   : > { %s1830_s10 = scalar_select %p183_p7, %s1725_s23, %s185_s30  }
   0xd   : > { %p265_p10 = pnand %p1493_p6, %p264_p9 }
   0xe   : > { %p313_p11 = scmp.lt.s32.totalorder (!%p265_p10), %s1729_s24, 1  ;;  %s309_s30 = sand.u32 (!%p265_p10), 1, %s1721_s22  }
   0xf   : > { %268 = sbr.rel (%p265_p10) target bundleno = 274 (0x112), region = 44  ;;  %s1494_s8 = sshll.u32 (!%p265_p10), %s309_s30, 4 }
  0x10   : > { %s1507_s17 = sshll.u32 (!%p265_p10), %s1729_s24, 8  ;;  %s1739_s11 = smov (!%p265_p10), [#allocation2]  }
  0x11   : > { %s1665_s12 = sshll.u32 (!%p265_p10), %s1739_s11, 4  ;;  %s1666_s12 = int_to_ptr.vmem [resolvable:$false] %s1665_s12 }
  0x12   : > { %s1667_s13 = scalar_lea.vmem (!%p265_p10), %s1666_s12, 512 }
  0x14   : > { %v344_v0 = vld [vmem:[%s1939_s3] sm:$0x3]  ;;  %vm352_vm0 = vcmask 1041408   ;;  %vm852_vm1 = vcmask 1044480   ;;  %s314_s15 = scalar_select %p313_p11, %s1729_s24, 1  ;;  %vm345_vm2 = vcmask 15360  }
  0x15   : > { %v354_v1 = vsel %vm352_vm0, %v344_v0, 0  ;;  %v341_v2 = vld [vmem:[%s1938_s2] sm:$0x1f]  ;;  %vm845_vm3 = vcmask 39936   ;;  %s1891_s24 = scalar_lea.sflag [#allocation3], %s309_s30 }
  0x16   : > { %v387_v3 = vand.u32 4294901760, %v354_v1  ;;  %v854_v4 = vsel %vm852_vm1, %v341_v2, 0  ;;  %s1505_s16 = sshll.u32 %s314_s15, 4  ;;  %s311_s15 = scalar_lea.vmem [#allocation2], %s1494_s8 }
  0x17   : > { %v1840_v5 = vand.u32 4294901760, %v854_v4  ;;  %s320_s19 = scalar_lea.vmem %s1936_s0, %s1505_s16  ;;  %s330_s28 = scalar_lea.vmem %s1937_s1, %s1505_s16 }
  0x18   : > { %1544 = vmatprep.subr.mxu0 %v387_v3  ;;  %v474_v6 = vsub.f32 %v354_v1, %v387_v3  ;;  %v340_v8 = vld [vmem:[%s320_s19 + $0x8] sm:$0xff]  ;;  %v342_v9 = vld [vmem:[%s330_s28] sm:$0xff]  ;;  %s1376_s16 = sshll.u32 %s311_s15, 4  ;;  %s1882_s16 = int_to_ptr.vmem [resolvable:$true] %s1376_s16 }
  0x19   : > { %1545 = vmatpush3.msra.mxu0 %v387_v3  ;;  %v343_v10 = vld [vmem:[%s330_s28 + $0x8] sm:$0xff]  ;;  %v1849_v11 = vsub.f32 %v854_v4, %v1840_v5  ;;  %v347_v12 = vsel %vm345_vm2, %v342_v9, 0  ;;  %v339_v14 = vld [vmem:[%s320_s19] sm:$0xff]  ;;  %v850_v15 = vsel %vm845_vm3, %v340_v8, 0  ;;  %s1887_s28 = scalar_lea.hbm %s1942_s6, %s1507_s17  ;;  %s1661_s8 = scalar_lea.vmem %s1882_s16, 256 }
  0x1a   : > { %v475_v7 = vand.u32 4294901760, %v474_v6  ;;  %1554 = vmatprep.subr.mxu0 %v474_v6  ;;  %v350_v13 = vsel %vm345_vm2, %v343_v10, 0  ;;  %v422_v17 = vand.u32 4294901760, %v347_v12  ;;  %v847_v19 = vsel %vm845_vm3, %v339_v14, 0  ;;  %p1662_p12 = scmp.ne.s32.totalorder %s1882_s16, %s1661_s8  ;;  %p1668_p1 = scmp.lt.s32.totalorder %s1882_s16, %s1666_s12 }
  0x1b   : > { %v432_v18 = vand.u32 4294901760, %v350_v13  ;;  %v1853_v20 = vand.u32 4294901760, %v847_v19  ;;  %v975_v24 = vand.u32 4294901760, %v1849_v11  ;;  %v932_v25 = vand.u32 4294901760, %v850_v15  ;;  %p1669_p2 = scmp.lt.s32.totalorder %s1667_s13, %s1661_s8 }
  0x1c   : > { %v476_v16 = vsub.f32 %v474_v6, %v475_v7  ;;  %v423_v22 = vsub.f32 %v347_v12, %v422_v17  ;;  %1551 = vmatprep.mubr.f32.mxu1 %v422_v17  ;;  %p1663_p13 = pnand %p1662_p12, %p1817_p4 }
  0x1d   : > { %v433_v23 = vsub.f32 %v350_v13, %v432_v18  ;;  %v923_v28 = vsub.f32 %v847_v19, %v1853_v20  ;;  %v976_v31 = vsub.f32 %v1849_v11, %v975_v24  ;;  %v933_v32 = vsub.f32 %v850_v15, %v932_v25  ;;  %v1499_v19 = vld [vmem:[%s1940_s4] ss:$0 sm:$0xff]  ;;  %p1670_p3 = por %p1669_p2, %p1668_p1 }
  0x1e   : > { %v477_v21 = vand.u32 4294901760, %v476_v16  ;;  %v424_v26 = vand.u32 4294901760, %v423_v22  ;;  %p1664_p0 = pneg %p1663_p13 }
  0x1f   : > { %v434_v27 = vand.u32 4294901760, %v433_v23  ;;  %v924_v35 = vand.u32 4294901760, %v923_v28  ;;  %v977_v36 = vand.u32 4294901760, %v976_v31  ;;  %v934_v37 = vand.u32 4294901760, %v933_v32 }
  0x20   : > { %1549 = vmatprep.subr.mxu1 %v477_v21  ;;  %v425_v29 = vsub.f32 %v423_v22, %v424_v26  ;;  %p1671_p5 = pnand %p1670_p3, %p1664_p0 }
  0x21   : > { %1550 = vmatpush3.msra.mxu1 %v477_v21  ;;  %v435_v30 = vsub.f32 %v433_v23, %v434_v27  ;;  %v925_v38 = vsub.f32 %v923_v28, %v924_v35  ;;  %v935_v39 = vsub.f32 %v933_v32, %v934_v37 }
  0x22   : > { %1552 = vmatmul.mubr.f32.vlgmr.msra.gmra.mxu1 %v432_v18  ;;  %1559 = vmatprep.subr.mxu1 %v387_v3  ;;  %v426_v33 = vand.u32 4294901760, %v425_v29 }
  0x23   : > { %1560 = vmatpush3.msra.mxu1 %v387_v3  ;;  %1561 = vmatprep.mubr.f32.mxu1 %v424_v26  ;;  %v436_v34 = vand.u32 4294901760, %v435_v30  ;;  %v926_v40 = vand.u32 4294901760, %v925_v38  ;;  %v936_v41 = vand.u32 4294901760, %v935_v39 }
  0x24   : > { %1569 = vmatprep.subr.mxu1 %v387_v3  ;;  %1546 = vmatprep.mubr.f32.mxu0 %v426_v33 }
  0x25   : > { %1547 = vmatmul.mubr.f32.vlgmr.msra.gmra.mxu0 %v436_v34 }
  0x26   : > { %1562 = vmatmul.mubr.f32.vlgmr.msra.gmra.mxu1 %v434_v27  ;;  %1555 = vmatpush3.msra.mxu0 %v474_v6  ;;  %v1354_v27 = vld [vmem:[%s1941_s5] sm:$0xff] }
  0x27   : > { %1570 = vmatpush3.msra.mxu1 %v387_v3  ;;  %1556 = vmatprep.mubr.f32.mxu0 %v423_v22 }
  0x28   : > { %1564 = vmatprep.subr.mxu0 %v475_v7  ;;  %1571 = vmatprep.mubr.f32.mxu1 %v422_v17 }
  0x29   : > { %1579 = vmatprep.subr.mxu1 %v977_v36  ;;  %1557 = vmatmul.mubr.f32.vlgmr.msra.gmra.mxu0 %v433_v23  ;;  %v1355_v23 = vld [vmem:[%s1941_s5 + $0x8] sm:$0xff] }
  0x2a   : > { %1572 = vmatmul.mubr.f32.vlgmr.msra.gmra.mxu1 %v432_v18  ;;  %1565 = vmatpush3.msra.mxu0 %v475_v7 }
  0x2b   : > { %1580 = vmatpush3.msra.mxu1 %v977_v36  ;;  %1566 = vmatprep.mubr.f32.mxu0 %v422_v17 }
  0x2c   : > { %1574 = vmatprep.subr.mxu0 %v1840_v5  ;;  %1581 = vmatprep.mubr.f32.mxu1 %v1853_v20 }
  0x2d   : > { %1589 = vmatprep.subr.mxu1 %v1840_v5  ;;  %1567 = vmatmul.mubr.f32.vlgmr.msra.gmra.mxu0 %v432_v18 }
  0x2e   : > { %1582 = vmatmul.mubr.f32.vlgmr.msra.gmra.mxu1 %v932_v25  ;;  %1575 = vmatpush3.msra.mxu0 %v1840_v5 }
  0x2f   : > { %1590 = vmatpush3.msra.mxu1 %v1840_v5  ;;  %1576 = vmatprep.mubr.f32.mxu0 %v926_v40 }
  0x30   : > { %1584 = vmatprep.subr.mxu0 %v1849_v11  ;;  %1591 = vmatprep.mubr.f32.mxu1 %v924_v35 }
  0x31   : > { %1599 = vmatprep.subr.mxu1 %v1840_v5  ;;  %1577 = vmatmul.mubr.f32.vlgmr.msra.gmra.mxu0 %v936_v41 }
  0x32   : > { %1592 = vmatmul.mubr.f32.vlgmr.msra.gmra.mxu1 %v934_v37  ;;  %1585 = vmatpush3.msra.mxu0 %v1849_v11 }
  0x33   : > { %1600 = vmatpush3.msra.mxu1 %v1840_v5  ;;  %1586 = vmatprep.mubr.f32.mxu0 %v923_v28 }
  0x34   : > { %1594 = vmatprep.subr.mxu0 %v975_v24  ;;  %1601 = vmatprep.mubr.f32.mxu1 %v1853_v20 }
  0x35   : > { %1587 = vmatmul.mubr.f32.vlgmr.msra.gmra.mxu0 %v933_v32 }
  0x36   : > { %1602 = vmatmul.mubr.f32.vlgmr.msra.gmra.mxu1 %v932_v25  ;;  %1595 = vmatpush3.msra.mxu0 %v975_v24 }
  0x37   : > { %1596 = vmatprep.mubr.f32.mxu0 %v1853_v20 }
  0x39   : > { %1597 = vmatmul.mubr.f32.vlgmr.msra.gmra.mxu0 %v932_v25 }
  0xe2   : > { %v1553_v42 = vpop.f32.mrf.mxu1 }
  0xe4   : > { %v514_v43 = vpop.f32.mrf.mxu1 }
  0xe5   : > { %v1548_v45 = vpop.f32.mrf.mxu0 }
  0xe6   : > { %v1563_v44 = vpop.f32.mrf.mxu1  ;;  %v521_v48 = vadd.f32 %v1553_v42, %v1548_v45 }
  0xe7   : > { %v428_v47 = vpop.f32.mrf.mxu0 }
  0xe8   : > { %v675_v46 = vpop.f32.mrf.mxu1  ;;  %v515_v51 = vadd.f32 %v514_v43, %v428_v47 }
  0xe9   : > { %v1558_v50 = vpop.f32.mrf.mxu0 }
  0xea   : > { %v1573_v49 = vpop.f32.mrf.mxu1  ;;  %v602_v52 = vadd.f32 %v1558_v50, %v521_v48 }
  0xeb   : > { %v594_v54 = vpop.f32.mrf.mxu0 }
  0xec   : > { %v835_v53 = vpop.f32.mrf.mxu1  ;;  %v684_v55 = vadd.f32 %v1563_v44, %v602_v52  ;;  %v595_v56 = vadd.f32 %v594_v54, %v515_v51 }
  0xed   : > { %v1568_v58 = vpop.f32.mrf.mxu0 }
  0xee   : > { %v1583_v57 = vpop.f32.mrf.mxu1  ;;  %v676_v59 = vadd.f32 %v675_v46, %v595_v56  ;;  %v764_v60 = vadd.f32 %v1568_v58, %v684_v55 }
  0xef   : > { %v757_v62 = vpop.f32.mrf.mxu0 }
  0xf0   : > { %v1014_v61 = vpop.f32.mrf.mxu1  ;;  %v842_v63 = vadd.f32 %v1573_v49, %v764_v60  ;;  %v758_v0 = vadd.f32 %v757_v62, %v676_v59 }
  0xf1   : > { %v1578_v1 = vpop.f32.mrf.mxu0 }
  0xf2   : > { %v1593_v2 = vpop.f32.mrf.mxu1  ;;  %v836_v3 = vadd.f32 %v835_v53, %v758_v0  ;;  %v939_v4 = vadd.f32 %v1578_v1, %v842_v63 }
  0xf3   : > { %v928_v5 = vpop.f32.mrf.mxu0 }
  0xf4   : > { %v1021_v6 = vadd.f32 %v1583_v57, %v939_v4  ;;  %v929_v7 = vadd.f32 %v928_v5, %v836_v3  ;;  %v1175_v9 = vpop.f32.mrf.mxu1 }
  0xf5   : > { %v1588_v8 = vpop.f32.mrf.mxu0 }
  0xf6   : > { %v1015_v10 = vadd.f32 %v1014_v61, %v929_v7  ;;  %v1102_v11 = vadd.f32 %v1588_v8, %v1021_v6  ;;  %v1603_v16 = vpop.f32.mrf.mxu1 }
  0xf7   : > { %v1094_v12 = vpop.f32.mrf.mxu0 }
  0xf8   : > { %v1184_v13 = vadd.f32 %v1593_v2, %v1102_v11  ;;  %v1095_v14 = vadd.f32 %v1094_v12, %v1015_v10  ;;  %v1335_v24 = vpop.f32.mrf.mxu1 }
  0xf9   : > { %v1598_v15 = vpop.f32.mrf.mxu0 }
  0xfa   : > { %v1176_v17 = vadd.f32 %v1175_v9, %v1095_v14  ;;  %v1264_v18 = vadd.f32 %v1598_v15, %v1184_v13 }
  0xfb   : > { %v1257_v20 = vpop.f32.mrf.mxu0 }
  0xfc   : > { %v1342_v21 = vadd.f32 %v1603_v16, %v1264_v18  ;;  %v1258_v22 = vadd.f32 %v1257_v20, %v1176_v17 }
  0xfe   : > { %v1353_v25 = vadd.f32 %v1499_v19, %v1342_v21  ;;  %v1336_v26 = vadd.f32 %v1335_v24, %v1258_v22 }
 0x100   : > { %v1357_v28 = vadd.f32 %v1355_v23, %v1353_v25  ;;  %v1352_v29 = vadd.f32 %v1499_v19, %v1336_v26 }
 0x102   : > { %1359 = vst [vmem:[%s311_s15 + $0x8] sm:$0xff] %v1357_v28  ;;  %v1356_v30 = vadd.f32 %v1354_v27, %v1352_v29 }
 0x104   : > { %1358 = vst [vmem:[%s311_s15] sm:$0xff] %v1356_v30 }
 0x105   : > { %1674 = shalt.err (!%p1671_p5)
}
 0x106   : > { %s1675_s30 = scalar_lea.hbm %s1887_s28, 256  ;;  %s1679_s17 = scalar_lea.hbm %s1942_s6, 512 }
 0x107   : > { %p1676_p6 = scmp.ne.s32.totalorder %s1887_s28, %s1675_s30  ;;  %p1680_p10 = scmp.lt.s32.totalorder %s1887_s28, %s1942_s6 }
 0x108   : > { %p1681_p11 = scmp.lt.s32.totalorder %s1679_s17, %s1675_s30 }
 0x109   : > { %p1677_p7 = pnand %p1676_p6, %p1817_p4 }
 0x10a   : > { %p1682_p12 = por %p1681_p11, %p1680_p10 }
 0x10b   : > { %p1678_p9 = pneg %p1677_p7 }
 0x10d   : > { %p1683_p13 = pnand %p1682_p12, %p1678_p9 }
 0x10f   : > { %1686 = shalt.err (!%p1683_p13)
}
 0x110   : > { %s1740_s20 = smov 128   ;;  %s1741_s27 = smov 8  }
 0x111   : > { %1604 = dma.vmem_to_hbm [thread:$0]  (%p1817_p4), %s1882_s16, 256, %s1887_s28, %s1891_s24, %s1740_s20, %s1740_s20, %s1741_s27  }
 0x112 PF: > { %p1610_p0 = scmp.ge.s32.totalorder %s1737_s26, 2  ;;  %s1391_s8 = sand.u32 1, %s1717_s21  }
 0x113   : > { %s1392_s11 = scalar_lea.sflag [#allocation3], %s1391_s8 }
 0x114   : > { %p1607_p1 = pnand %p1610_p0, %p1824_p8 }
 0x116   : > { %p1608_p2 = pneg %p1607_p1 }
 0x118   : > { %1712 = dma.done.wait (%p1608_p2), %s1392_s11, 256  }
 0x119   : > { %1714 = vsyncadd (%p1608_p2), %s1392_s11, 4294967040  ;;  %s19_s26 = sadd.s32 1, %s1737_s26   ;;  %s1945_s21 = smov %s1721_s22 }
 0x11a   : > { %p16_p3 = scmp.ge.s32.totalorder %s19_s26, 4   ;;  %s1946_s22 = smov %s1725_s23 }
 0x11b   : > { %s1947_s23 = smov %s1830_s10  ;;  %s1948_s24 = smov %s1733_s25 }
 0x11c   : > { %s1949_s25 = smov %s1951_s29  ;;  %18 = sbr.rel (!%p16_p3) target bundleno = 4 (0x4), region = 85 }
 0x121   :  { %1397 = vsyncpa [#allocation3], 1 }
 0x122   :  { %1399 = vsyncpa [#allocation3 + $0x1], 1 }

</bundles_post_ra>
